<compile_context>
chip_gen: v7x
topology: tpu7x:2x2x1
jax: 0.10.0
libtpu: 0.0.40
codegen_flags: <defaults>
</compile_context>

<pallas_src>
import jax
import jax.numpy as jnp
from jax.experimental import pallas as pl
from jax.experimental.pallas import tpu as pltpu

TEMPERATURE = 0.1
CONTRASTIVE_WEIGHT = 0.1


def _choose_tile_n(n_rows: int, k: int) -> int:
    """Lane-tile size over N: multiple of 128, neg tile capped ~4 MiB/buffer."""
    budget_bytes = 4 * 1024 * 1024
    tn = (budget_bytes // (4 * max(k, 1))) // 128 * 128
    tn = max(128, min(2048, tn))
    # Do not tile wider than N itself (rounded up to a full lane group).
    n_lanes = ((n_rows + 127) // 128) * 128
    return min(tn, max(128, n_lanes))


def _make_contrastive_kernel(n_rows: int, tn: int, temperature: float,
                             weight: float):
    inv_t = 1.0 / float(temperature)
    scale = float(weight) / float(n_rows)

    def kernel(pos_ref, neg_ref, out_ref, acc_ref):
        # pos_ref: (1, TN)  positive similarity (N on lanes)
        # neg_ref: (K, TN)  negative similarities (K on sublanes, N on lanes)
        i = pl.program_id(0)

        @pl.when(i == 0)
        def _init():
            acc_ref[...] = jnp.zeros_like(acc_ref)

        pos = pos_ref[...].astype(jnp.float32) * inv_t          # (1, TN)
        neg = neg_ref[...].astype(jnp.float32) * inv_t          # (K, TN)

        # Row-wise (here: per-column) max over [pos | neg] for stability.
        m = jnp.maximum(pos, jnp.max(neg, axis=0, keepdims=True))      # (1, TN)

        # logsumexp over the concatenated row without materializing the cat.
        sum_exp = jnp.exp(pos - m) + jnp.sum(jnp.exp(neg - m), axis=0,
                                             keepdims=True)            # (1, TN)
        lse = m + jnp.log(sum_exp)                                      # (1, TN)

        # CE with target class 0 (the positive logit) per sample.
        per_col = lse - pos                                             # (1, TN)

        # Mask out the columns that are only padding (N rounded up to TN).
        col = i * tn + jax.lax.broadcasted_iota(jnp.int32, (1, tn), 1)
        per_col = jnp.where(col < n_rows, per_col, 0.0)

        # Lane reduce -> (1,1) partial sum, accumulate across grid steps.
        acc_ref[...] += jnp.sum(per_col, axis=1, keepdims=True)

        @pl.when(i == pl.num_programs(0) - 1)
        def _finalize():
            out_ref[...] = acc_ref[...] * scale

    return kernel


def contrastive_decouple_head_forward(pos, neg, flag=None,
                                      temperature=TEMPERATURE,
                                      contrastive_weight=CONTRASTIVE_WEIGHT):
    """Pallas equivalent of ContrastiveDecoupleHead.forward.

    Args:
      pos: (N, 1) positive similarity (f32 or bf16).
      neg: (N, K) negative similarity (f32 or bf16).
    Returns:
      dict with the single scalar loss.
    """
    n = pos.shape[0]
    k = neg.shape[1]

    # Lane-dense layout: N -> lanes. pos reshape is free (same linear layout);
    # neg needs one transpose in the wrapper (cheap vs. the 16x vreg-occupancy
    # win for small K).
    pos_t = pos.reshape(1, n)          # (1, N)
    neg_t = jnp.transpose(neg)         # (K, N)

    tn = _choose_tile_n(n, k)
    num_tiles = (n + tn - 1) // tn
    n_pad = num_tiles * tn
    if n_pad != n:
        pos_t = jnp.pad(pos_t, ((0, 0), (0, n_pad - n)))
        neg_t = jnp.pad(neg_t, ((0, 0), (0, n_pad - n)))

    kernel = _make_contrastive_kernel(n, tn, temperature, contrastive_weight)

    itemsize = jnp.dtype(pos.dtype).itemsize
    cost = pl.CostEstimate(
        flops=6 * n * (k + 1),
        transcendentals=n * (k + 2),            # (K+1) exp + 1 log per row
        bytes_accessed=itemsize * n * (k + 1) + 4,
    )

    loss = pl.pallas_call(
        kernel,
        out_shape=jax.ShapeDtypeStruct((1, 1), jnp.float32),
        grid_spec=pltpu.PrefetchScalarGridSpec(
            num_scalar_prefetch=0,
            grid=(num_tiles,),
            in_specs=[
                pl.BlockSpec((1, tn), lambda i: (0, i)),   # pos  (1, N)
                pl.BlockSpec((k, tn), lambda i: (0, i)),   # neg  (K, N)
            ],
            out_specs=pl.BlockSpec((1, 1), lambda i: (0, 0)),
            scratch_shapes=[pltpu.VMEM((1, 1), jnp.float32)],
        ),
        compiler_params=pltpu.CompilerParams(
            dimension_semantics=("arbitrary",),     # shared accumulator
            vmem_limit_bytes=32 * 1024 * 1024,      # explicit (v5e default 16M)
        ),
        cost_estimate=cost,
    )(pos_t, neg_t)[0, 0]

    key = 'loss_' + flag + '_contrastive' if flag else 'loss_contrastive'
    return {key: loss}


def init_unused_mlp_params(in_channels, hid_channels, out_channels,
                           key=jax.random.PRNGKey(42)):
    """Parameters defined in __init__ (MLP/BN/avgpool) but never used by
    forward(); created only to mirror the module definition."""
    k1, k2 = jax.random.split(key)
    return {
        'fc1_w': jax.random.normal(k1, (hid_channels, in_channels),
                                   jnp.float32) * 0.01,
        'fc1_b': jnp.zeros((hid_channels,), jnp.float32),
        'bn_gamma': jnp.ones((hid_channels,), jnp.float32),
        'bn_beta': jnp.zeros((hid_channels,), jnp.float32),
        'fc2_w': jax.random.normal(k2, (out_channels, hid_channels),
                                   jnp.float32) * 0.01,
        'fc2_b': jnp.zeros((out_channels,), jnp.float32),
    }


def _reference_loss(pos, neg, temperature, weight):
    """Pure-JAX reference (torch CrossEntropyLoss with label 0, mean reduce)."""
    logits = jnp.concatenate([pos, neg], axis=1).astype(jnp.float32) / temperature
    lse = jax.scipy.special.logsumexp(logits, axis=1)
    per_row = lse - logits[:, 0]
    return jnp.mean(per_row) * weight


if __name__ == "__main__":
    in_channels, hid_channels, out_channels = 32, 16, 8
    _ = init_unused_mlp_params(in_channels, hid_channels, out_channels)

    key = jax.random.PRNGKey(0)

    # Case 1: production-like tiny shape (N=8 samples, K=8 negatives).
    k_pos, k_neg, key = jax.random.split(key, 3)
    pos = jax.random.normal(k_pos, (8, 1), jnp.float32)
    neg = jax.random.normal(k_neg, (8, 8), jnp.float32)
    loss = jax.block_until_ready(
        contrastive_decouple_head_forward(pos, neg)['loss_contrastive'])
    ref = _reference_loss(pos, neg, TEMPERATURE, CONTRASTIVE_WEIGHT)
    assert jnp.allclose(loss, ref, rtol=1e-5, atol=1e-6), (loss, ref)

    # Case 2: multi-tile grid + lane masking (N not a multiple of 128).
    k_pos, k_neg = jax.random.split(key)
    pos2 = jax.random.normal(k_pos, (300, 1), jnp.float32)
    neg2 = jax.random.normal(k_neg, (300, 16), jnp.float32)
    loss2 = jax.block_until_ready(
        contrastive_decouple_head_forward(pos2, neg2, flag='aux')
        ['loss_aux_contrastive'])
    ref2 = _reference_loss(pos2, neg2, TEMPERATURE, CONTRASTIVE_WEIGHT)
    assert jnp.allclose(loss2, ref2, rtol=1e-5, atol=1e-6), (loss2, ref2)

    print("KERNEL_OK")
</pallas_src>

<mosaic_0001>
module attributes {stable_mosaic.version = 11 : i64} {
  func.func @kernel(%arg0: i32, %arg1: memref<1x128xf32, #tpu.memory_space<vmem>>, %arg2: memref<8x128xf32, #tpu.memory_space<vmem>>, %arg3: memref<1x1xf32, #tpu.memory_space<vmem>>, %arg4: memref<1x1xf32, #tpu.memory_space<vmem>>) attributes {dimension_semantics = [#tpu.dimension_semantics<arbitrary>], iteration_bounds = array<i64: 1>, scalar_prefetch = 0 : i64, scratch_operands = 1 : i64, tpu.core_type = #tpu.core_type<tc>, window_params = [{transform_indices = @transform_0, window_bounds = array<i64: 1, 128>}, {transform_indices = @transform_1, window_bounds = array<i64: 8, 128>}, {pipeline_mode = #tpu.pipeline_mode<synchronous>, transform_indices = @transform_2, window_bounds = array<i64: 1, 1>}]} {
    %c0_i32 = arith.constant 0 : i32
    %0 = arith.cmpi eq, %arg0, %c0_i32 : i32
    %1 = arith.extui %0 : i1 to i32
    %c0_i32_0 = arith.constant 0 : i32
    %2 = arith.cmpi ne, %1, %c0_i32_0 : i32
    scf.if %2 {
      %cst_15 = arith.constant 0.000000e+00 : f32
      %39 = vector.broadcast %cst_15 : f32 to vector<1x1xf32>
      %c0_16 = arith.constant 0 : index
      %c0_17 = arith.constant 0 : index
      %40 = vector.load %arg4[%c0_16, %c0_17] : memref<1x1xf32, #tpu.memory_space<vmem>>, vector<1x1xf32>
      tpu.vector_store %arg4[%c0_16, %c0_17], %39 {strides = array<i32>} : memref<1x1xf32, #tpu.memory_space<vmem>>, vector<1x1xf32>,
    } else {
    }
    %c0 = arith.constant 0 : index
    %c0_1 = arith.constant 0 : index
    %3 = vector.load %arg1[%c0, %c0_1] : memref<1x128xf32, #tpu.memory_space<vmem>>, vector<1x128xf32>
    %cst = arith.constant 1.000000e+01 : f32
    %4 = vector.broadcast %cst : f32 to vector<1x128xf32>
    %5 = arith.mulf %3, %4 : vector<1x128xf32>
    %c0_2 = arith.constant 0 : index
    %c0_3 = arith.constant 0 : index
    %6 = vector.load %arg2[%c0_2, %c0_3] : memref<8x128xf32, #tpu.memory_space<vmem>>, vector<8x128xf32>
    %cst_4 = arith.constant 1.000000e+01 : f32
    %7 = vector.broadcast %cst_4 : f32 to vector<8x128xf32>
    %8 = arith.mulf %6, %7 : vector<8x128xf32>
    %cst_5 = arith.constant dense<0xFF800000> : vector<128xf32>
    %9 = vector.multi_reduction <maximumf>, %8, %cst_5 [0] : vector<8x128xf32> to vector<128xf32>
    %10 = vector.shape_cast %9 : vector<128xf32> to vector<1x128xf32>
    %11 = arith.maximumf %5, %10 : vector<1x128xf32>
    %12 = arith.subf %5, %11 : vector<1x128xf32>
    %13 = math.exp %12 : vector<1x128xf32>
    %14 = vector.broadcast %11 : vector<1x128xf32> to vector<8x128xf32>
    %15 = arith.subf %8, %14 : vector<8x128xf32>
    %16 = math.exp %15 : vector<8x128xf32>
    %cst_6 = arith.constant dense<0.000000e+00> : vector<128xf32>
    %17 = vector.multi_reduction <add>, %16, %cst_6 [0] : vector<8x128xf32> to vector<128xf32>
    %18 = vector.shape_cast %17 : vector<128xf32> to vector<1x128xf32>
    %19 = arith.addf %13, %18 : vector<1x128xf32>
    %20 = math.log %19 : vector<1x128xf32>
    %21 = arith.addf %11, %20 : vector<1x128xf32>
    %22 = arith.subf %21, %5 : vector<1x128xf32>
    %c128_i32 = arith.constant 128 : i32
    %23 = arith.muli %arg0, %c128_i32 : i32
    %24 = tpu.iota {dimensions = array<i32: 1>} : vector<1x128xi32>
    %25 = vector.broadcast %23 : i32 to vector<1x128xi32>
    %26 = arith.addi %25, %24 : vector<1x128xi32>
    %c8_i32 = arith.constant 8 : i32
    %27 = vector.broadcast %c8_i32 : i32 to vector<1x128xi32>
    %28 = arith.cmpi slt, %26, %27 : vector<1x128xi32>
    %cst_7 = arith.constant 0.000000e+00 : f32
    %29 = vector.broadcast %cst_7 : f32 to vector<1x128xf32>
    %30 = arith.select %28, %22, %29 : vector<1x128xi1>, vector<1x128xf32>
    %c0_8 = arith.constant 0 : index
    %c0_9 = arith.constant 0 : index
    %31 = vector.load %arg4[%c0_8, %c0_9] : memref<1x1xf32, #tpu.memory_space<vmem>>, vector<1x1xf32>
    %cst_10 = arith.constant dense<0.000000e+00> : vector<1xf32>
    %32 = vector.multi_reduction <add>, %30, %cst_10 [1] : vector<1x128xf32> to vector<1xf32>
    %33 = vector.shape_cast %32 : vector<1xf32> to vector<1x1xf32>
    %34 = arith.addf %31, %33 : vector<1x1xf32>
    %c0_11 = arith.constant 0 : index
    %c0_12 = arith.constant 0 : index
    %35 = vector.load %arg4[%c0_11, %c0_12] : memref<1x1xf32, #tpu.memory_space<vmem>>, vector<1x1xf32>
    tpu.vector_store %arg4[%c0_11, %c0_12], %34 {strides = array<i32>} : memref<1x1xf32, #tpu.memory_space<vmem>>, vector<1x1xf32>,
    %c0_i32_13 = arith.constant 0 : i32
    %36 = arith.cmpi eq, %arg0, %c0_i32_13 : i32
    %37 = arith.extui %36 : i1 to i32
    %c0_i32_14 = arith.constant 0 : i32
    %38 = arith.cmpi ne, %37, %c0_i32_14 : i32
    scf.if %38 {
      %c0_15 = arith.constant 0 : index
      %c0_16 = arith.constant 0 : index
      %39 = vector.load %arg4[%c0_15, %c0_16] : memref<1x1xf32, #tpu.memory_space<vmem>>, vector<1x1xf32>
      %cst_17 = arith.constant 1.250000e-02 : f32
      %40 = vector.broadcast %cst_17 : f32 to vector<1x1xf32>
      %41 = arith.mulf %39, %40 : vector<1x1xf32>
      %c0_18 = arith.constant 0 : index
      %c0_19 = arith.constant 0 : index
      %42 = vector.load %arg3[%c0_18, %c0_19] : memref<1x1xf32, #tpu.memory_space<vmem>>, vector<1x1xf32>
      tpu.vector_store %arg3[%c0_18, %c0_19], %41 {strides = array<i32>} : memref<1x1xf32, #tpu.memory_space<vmem>>, vector<1x1xf32>,
    } else {
    }
    return
  }
  func.func @transform_0(%arg0: i32) -> (i32, i32) {
    %c0_i32 = arith.constant 0 : i32
    %c0_i32_0 = arith.constant 0 : i32
    return %c0_i32, %arg0 : i32, i32
  }
  func.func @transform_1(%arg0: i32) -> (i32, i32) {
    %c0_i32 = arith.constant 0 : i32
    %c0_i32_0 = arith.constant 0 : i32
    return %c0_i32, %arg0 : i32, i32
  }
  func.func @transform_2(%arg0: i32) -> (i32, i32) {
    %c0_i32 = arith.constant 0 : i32
    %c0_i32_0 = arith.constant 0 : i32
    %c0_i32_1 = arith.constant 0 : i32
    return %c0_i32, %c0_i32_0 : i32, i32
  }
}

</mosaic_0001>

<bundles_post_ra>
// kernel: tpu_custom_call.1
= control target key start
LH: loop header
LB: loop body
LE: loop exit
PB: predicated region body
PF: predicated region fallthrough
CT: control target
= control target key end

     0   :  { %7 = vsyncpa [#allocation4], 0  ;;  %s253_s0 = inlined_call_operand.hbm [shape: f32[1,128], index: 0, kind: input, shape index: {}]   ;;  %s254_s1 = inlined_call_operand.hbm [shape: f32[8,128], index: 1, kind: input, shape index: {}]   ;;  %s255_s2 = inlined_call_operand.hbm [shape: f32[1,1], index: 2, kind: output, shape index: {}]  }
   0x1   :  { %8 = vsyncpa [#allocation7], 0 }
   0x2   :  { %9 = vsyncpa [#allocation5], 0  ;;  %s195_s9 = smov [#allocation3]   ;;  %s196_s11 = smov [#allocation6]  }
   0x3   :  { %s16_s10 = sshll.u32 %s195_s9, 4  ;;  %s26_s12 = sshll.u32 %s196_s11, 4  ;;  %s17_s10 = int_to_ptr.vmem [resolvable:$true] %s16_s10  ;;  %s27_s12 = int_to_ptr.vmem [resolvable:$true] %s26_s12 }
   0x4   :  { %s123_s15 = scalar_lea.hbm %s253_s0, 16 }
   0x5   :  { %p124_p0 = scmp.ne.s32.totalorder %s253_s0, %s123_s15  ;;  %p127_p1 = scmp.lt.u32.totalorder %s123_s15, %s253_s0 }
   0x7   :  { %p129_p2 = pnand %p127_p1, %p124_p0 }
   0x9   :  { %132 = shalt.err (!%p129_p2)
}
   0xa   :  { %s133_s20 = scalar_lea.vmem %s17_s10, 16  ;;  %s137_s21 = scalar_lea.vmem %s17_s10, 32 }
   0xb   :  { %p134_p3 = scmp.ne.s32.totalorder %s17_s10, %s133_s20  ;;  %p138_p4 = scmp.lt.s32.totalorder %s17_s10, %s17_s10 }
   0xc   :  { %p139_p5 = scmp.lt.s32.totalorder %s137_s21, %s133_s20 }
   0xe   :  { %p140_p6 = por %p139_p5, %p138_p4 }
  0x10   :  { %p141_p7 = pnand %p140_p6, %p134_p3 }
  0x12   :  { %144 = shalt.err (!%p141_p7)
}
  0x13   :  { %19 = dma.hbm_to_vmem [thread:$0]  %s253_s0, 16, %s17_s10, [#allocation4]  }
  0x14   :  { %s145_s26 = scalar_lea.hbm %s254_s1, 128 }
  0x15   :  { %p146_p8 = scmp.ne.s32.totalorder %s254_s1, %s145_s26  ;;  %p149_p9 = scmp.lt.u32.totalorder %s145_s26, %s254_s1 }
  0x17   :  { %p151_p10 = pnand %p149_p9, %p146_p8 }
  0x19   :  { %154 = shalt.err (!%p151_p10)
}
  0x1a   :  { %s155_s3 = scalar_lea.vmem %s27_s12, 128  ;;  %p160_p12 = scmp.lt.s32.totalorder %s27_s12, %s27_s12 }
  0x1b   :  { %p156_p11 = scmp.ne.s32.totalorder %s27_s12, %s155_s3  ;;  %p161_p13 = scmp.lt.s32.totalorder %s155_s3, %s155_s3 }
  0x1d   :  { %p162_p0 = por %p161_p13, %p160_p12 }
  0x1f   :  { %p163_p1 = pnand %p162_p0, %p156_p11 }
  0x21   :  { %166 = shalt.err (!%p163_p1)
}
  0x22   :  { %29 = dma.hbm_to_vmem [thread:$0]  %s254_s1, 128, %s27_s12, [#allocation7]  }
  0x23   :  { %189 = dma.done.wait [#allocation4], 16  }
  0x24   :  { %190 = vsyncadd [#allocation4], 4294967280 }
  0x25   :  { %191 = dma.done.wait [#allocation7], 128  }
  0x26   :  { %192 = vsyncadd [#allocation7], 4294967168  ;;  %vm40_vm0 = vcmask 0   ;;  %v197_v0 = vmov 0.0   ;;  %v44_v1 = vld [vmem:[#allocation6] sm:$0xff]  ;;  %v57_v5 = vlaneseq  ;;  %vm84_vm2 = vcmask 1040384  }
  0x27   :  { %41 = vst.msk [vmem:[#allocation2] sm:$0x1] %vm40_vm0, %v197_v0  ;;  %v45_v2 = vmul.f32 10.0, %v44_v1  ;;  %v42_v7 = vld [vmem:[#allocation3] sm:$0x1]  ;;  %s198_s1 = smov [#allocation8]  }
  0x28   :  { %v58_v9 = vshrl.u32 %v57_v5, 7  ;;  %v43_v10 = vmul.f32 10.0, %v42_v7  ;;  %v78_v30 = vand.u32 127, %v57_v5  ;;  %s103_s5 = sshll.u32 %s198_s1, 4  ;;  %s104_s5 = int_to_ptr.vmem [resolvable:$true] %s103_s5 }
  0x29   :  { %v46_v3 = vrot.slane %v45_v2, 4  ;;  %s167_s6 = scalar_lea.vmem %s104_s5, 16  ;;  %s171_s7 = scalar_lea.vmem %s104_s5, 32 }
  0x2a   :  { %v59_v13 = vsub.s32 0, %v58_v9  ;;  %vm81_vm1 = vcmp.lt.s32.totalorder %v78_v30, 8  ;;  %p168_p2 = scmp.ne.s32.totalorder %s104_s5, %s167_s6  ;;  %p172_p3 = scmp.lt.s32.totalorder %s104_s5, %s104_s5 }
  0x2b   :  { %v47_v4 = vmax.f32 %v45_v2, %v46_v3  ;;  %p173_p4 = scmp.lt.s32.totalorder %s171_s7, %s167_s6 }
  0x2d   :  { %v48_v6 = vrot.slane %v47_v4, 2  ;;  %p174_p5 = por %p173_p4, %p172_p3 }
  0x2e   :  { %v83_v36 = vld [vmem:[#allocation2] sm:$0x1] }
  0x2f   :  { %v49_v8 = vmax.f32 %v47_v4, %v48_v6  ;;  %p175_p6 = pnand %p174_p5, %p168_p2 }
  0x31   :  { %v50_v11 = vrot.slane %v49_v8, 1 }
  0x33   :  { %v51_v12 = vmax.f32 %v49_v8, %v50_v11 }
  0x35   :  { %v52_v14 = vmax.f32 %v43_v10, %v51_v12 }
  0x37   :  { %v60_v15 = vrot.slane %v52_v14, %v59_v13  ;;  %v53_v18 = vsub.f32 %v43_v10, %v52_v14 }
  0x39   :  { %v62_v16 = vsub.f32 %v45_v2, %v60_v15  ;;  %v54_v19 = vmul.f32 1.442695, %v53_v18 }
  0x3b   :  { %v63_v17 = vmul.f32 1.442695, %v62_v16 }
  0x3d   :  { %117 = vpow2.f32 %v63_v17 }
  0x3e   :  { %119 = vpow2.f32 %v54_v19 }
  0x47   :  { %v118_v20 = vpop.eup %117 }
  0x48   :  { %v65_v21 = vrot.slane %v118_v20, 4  ;;  %v120_v26 = vpop.eup %119 }
  0x4a   :  { %v66_v22 = vadd.f32 %v118_v20, %v65_v21 }
  0x4c   :  { %v67_v23 = vrot.slane %v66_v22, 2 }
  0x4e   :  { %v68_v24 = vadd.f32 %v67_v23, %v66_v22 }
  0x50   :  { %v69_v25 = vrot.slane %v68_v24, 1 }
  0x52   :  { %v70_v27 = vadd.f32 %v69_v25, %v68_v24 }
  0x54   :  { %v71_v28 = vadd.f32 %v120_v26, %v70_v27 }
  0x56   :  { %121 = vlog2.f32 %v71_v28 }
  0x60   :  { %v122_v29 = vpop.eup %121 }
  0x61   :  { %v73_v31 = vmul.f32 0.6931472, %v122_v29 }
  0x63   :  { %v74_v32 = vadd.f32 %v73_v31, %v52_v14 }
  0x65   :  { %v75_v33 = vsub.f32 %v74_v32, %v43_v10 }
  0x67   :  { %v82_v34 = vsel %vm81_vm1, %v75_v33, 0.0 }
  0x68   :  { %v85_v35 = vsel %vm84_vm2, %v82_v34, 0.0 }
  0x69   :  { %86 = vadd.xlane.f32.xlu0 %v85_v35 }
  0xf6   :  { %v87_v37 = vpop.xlane.xlu0 %86 }
  0xf7   :  { %v88_v38 = vadd.f32 %v87_v37, %v83_v36 }
  0xf9   :  { %90 = vst.msk [vmem:[#allocation2] sm:$0x1] %vm40_vm0, %v88_v38 }
 0x100   :  { %v94_v39 = vld [vmem:[#allocation2] sm:$0x1] }
 0x101   :  { %v95_v40 = vmul.f32 0.0125, %v94_v39 }
 0x103   :  { %96 = vst.msk [vmem:[#allocation8] sm:$0x1] %vm40_vm0, %v95_v40 }
 0x104   :  { %178 = shalt.err (!%p175_p6)
}
 0x105   :  { %s179_s10 = scalar_lea.hbm %s255_s2, 16 }
 0x106   :  { %p180_p7 = scmp.ne.s32.totalorder %s255_s2, %s179_s10  ;;  %p183_p8 = scmp.lt.u32.totalorder %s179_s10, %s255_s2 }
 0x108   :  { %p185_p9 = pnand %p183_p8, %p180_p7 }
 0x10a   :  { %188 = shalt.err (!%p185_p9)
}
 0x10b   :  { %106 = dma.vmem_to_hbm [thread:$0]  %s104_s5, 16, %s255_s2, [#allocation5]  }
 0x10c   :  { %193 = dma.done.wait [#allocation5], 16  }
 0x10d   :  { %194 = vsyncadd [#allocation5], 4294967280 }
 0x10e   :  { %110 = vsyncpa [#allocation4], 1 }
 0x10f   :  { %111 = vsyncpa [#allocation7], 1 }
 0x110   :  { %112 = vsyncpa [#allocation5], 1 }

</bundles_post_ra>
